<compile_context>
chip_gen: v5e
topology: v5e:2x2
jax: 0.10.0
libtpu: 0.0.40
codegen_flags: <defaults>
</compile_context>

<pallas_src>
import jax
import jax.numpy as jnp
from jax.experimental import pallas as pl
from jax.experimental.pallas import tpu as pltpu


def _norm_kernel(scale_ref, bias_ref, x_ref, o_ref):
    # scale_ref / bias_ref : VMEM (row_block, 1)   fused per-row scale / bias
    # x_ref / o_ref        : VMEM (row_block, col_block) lane-dense tile
    o_ref[...] = x_ref[...] * scale_ref[...] - bias_ref[...]


def _round_up(x, m):
    return ((x + m - 1) // m) * m


_SMALL_INPUT_BYTES = 1 << 20        # below this, let XLA fuse the elementwise op
_TARGET_BLOCK_BYTES = 4 << 20       # ~4 MiB per block (HBM-streaming sweet spot)
_MAX_COL_BLOCK = 4096               # grow columns first (contiguous bursts)
_MAX_ROW_BLOCK = 256
_VMEM_LIMIT_BYTES = 48 << 20        # safe on v5e/v6e (128 MiB) and v7x (64 MiB)


def preproc_model_norm(x, rggb_max, mean, std, *, force_pallas=False):
    """x: (N, C, H, W); rggb_max: scalar; mean/std: (C,).

    Computes (x / rggb_max - mean) / std via the fused form
    x * scale - bias with scale = 1/(rggb_max*std), bias = mean/std.
    """
    N, C, H, W = x.shape
    dtype = x.dtype
    itemsize = jnp.dtype(dtype).itemsize

    # Fused per-channel affine params, computed in f32 then cast to x.dtype
    # (avoids compounding low-precision divisions when x is bf16/fp16).
    mean32 = jnp.asarray(mean, dtype=jnp.float32).reshape((C,))
    std32 = jnp.asarray(std, dtype=jnp.float32).reshape((C,))
    rggb32 = jnp.asarray(rggb_max, dtype=jnp.float32)
    scale_c = (1.0 / (rggb32 * std32)).astype(dtype)   # (C,)
    bias_c = (mean32 / std32).astype(dtype)            # (C,)

    R, L = N * C, H * W

    # Small-input fast path: pallas_call launch + grid-step fixed cost would
    # dominate; a single fused XLA elementwise op is faster.
    if (not force_pallas) and R * L * itemsize < _SMALL_INPUT_BYTES:
        return x * scale_c.reshape(1, C, 1, 1) - bias_c.reshape(1, C, 1, 1)

    # Lane-dense view: rows = (n, c) pairs, cols = whole spatial plane.
    x2 = x.reshape(R, L)
    scale_r = jnp.tile(scale_c, N).reshape(R, 1)
    bias_r = jnp.tile(bias_c, N).reshape(R, 1)

    # Tile selection: columns first (longer HBM bursts, unmasked full-width
    # stores), then rows, targeting ~4 MiB per block.
    col_block = min(_round_up(L, 128), _MAX_COL_BLOCK)
    target_rows = max(8, (_TARGET_BLOCK_BYTES // (col_block * itemsize)) // 8 * 8)
    row_block = min(_round_up(R, 8), min(_MAX_ROW_BLOCK, target_rows))

    # Ragged edges handled by Pallas (masked stores on edge blocks) -> no
    # wrapper-side pad/slice passes over HBM.
    grid = (pl.cdiv(R, row_block), pl.cdiv(L, col_block))

    out = pl.pallas_call(
        _norm_kernel,
        out_shape=jax.ShapeDtypeStruct((R, L), dtype),
        grid_spec=pl.GridSpec(
            grid=grid,  # column axis innermost: scale/bias blocks stay resident
            in_specs=[
                pl.BlockSpec((row_block, 1), lambda i, j: (i, 0)),
                pl.BlockSpec((row_block, 1), lambda i, j: (i, 0)),
                pl.BlockSpec((row_block, col_block), lambda i, j: (i, j)),
            ],
            out_specs=pl.BlockSpec((row_block, col_block), lambda i, j: (i, j)),
        ),
        compiler_params=pltpu.CompilerParams(
            dimension_semantics=("parallel", "parallel"),
            vmem_limit_bytes=_VMEM_LIMIT_BYTES,
        ),
    )(scale_r, bias_r, x2)

    return out.reshape(N, C, H, W)


if __name__ == "__main__":
    key = jax.random.PRNGKey(0)
    N, C, H, W = 2, 4, 16, 16  # RGGB-like 4-channel input

    # Deterministic "preproc_params" (synthetic, in-script).
    rggb_max = 1023.0
    mean = jnp.array([0.25, 0.30, 0.30, 0.28], dtype=jnp.float32)
    std = jnp.array([0.10, 0.12, 0.12, 0.11], dtype=jnp.float32)

    x = jax.random.uniform(
        key, (N, C, H, W), dtype=jnp.float32, minval=0.0, maxval=rggb_max
    )

    # Reference (original op order).
    ref = (x / rggb_max - mean.reshape(1, C, 1, 1)) / std.reshape(1, C, 1, 1)

    # Exercise the Pallas kernel explicitly (the test shape is tiny, so the
    # default path would take the small-input fast path).
    out_pallas = jax.block_until_ready(
        preproc_model_norm(x, rggb_max, mean, std, force_pallas=True)
    )
    assert jnp.allclose(out_pallas, ref, rtol=1e-5, atol=1e-5), "pallas path mismatch"

    # Also check the auto (small-input fast) path used in production for tiny x.
    out_auto = jax.block_until_ready(preproc_model_norm(x, rggb_max, mean, std))
    assert jnp.allclose(out_auto, ref, rtol=1e-5, atol=1e-5), "fast path mismatch"

    print("KERNEL_OK")
</pallas_src>

<mosaic_0001>
module attributes {stable_mosaic.version = 11 : i64} {
  func.func @_norm_kernel(%arg0: i32, %arg1: i32, %arg2: memref<8x1xf32, #tpu.memory_space<vmem>>, %arg3: memref<8x1xf32, #tpu.memory_space<vmem>>, %arg4: memref<8x256xf32, #tpu.memory_space<vmem>>, %arg5: memref<8x256xf32, #tpu.memory_space<vmem>>) attributes {dimension_semantics = [#tpu.dimension_semantics<parallel>, #tpu.dimension_semantics<parallel>], iteration_bounds = array<i64: 1, 1>, scalar_prefetch = 0 : i64, scratch_operands = 0 : i64, tpu.core_type = #tpu.core_type<tc>, window_params = [{transform_indices = @transform_0, window_bounds = array<i64: 8, 1>}, {transform_indices = @transform_1, window_bounds = array<i64: 8, 1>}, {transform_indices = @transform_2, window_bounds = array<i64: 8, 256>}, {transform_indices = @transform_3, window_bounds = array<i64: 8, 256>}]} {
    %c0 = arith.constant 0 : index
    %c0_0 = arith.constant 0 : index
    %0 = vector.load %arg4[%c0, %c0_0] : memref<8x256xf32, #tpu.memory_space<vmem>>, vector<8x256xf32>
    %c0_1 = arith.constant 0 : index
    %c0_2 = arith.constant 0 : index
    %1 = vector.load %arg2[%c0_1, %c0_2] : memref<8x1xf32, #tpu.memory_space<vmem>>, vector<8x1xf32>
    %2 = vector.broadcast %1 : vector<8x1xf32> to vector<8x256xf32>
    %3 = arith.mulf %0, %2 : vector<8x256xf32>
    %c0_3 = arith.constant 0 : index
    %c0_4 = arith.constant 0 : index
    %4 = vector.load %arg3[%c0_3, %c0_4] : memref<8x1xf32, #tpu.memory_space<vmem>>, vector<8x1xf32>
    %5 = vector.broadcast %4 : vector<8x1xf32> to vector<8x256xf32>
    %6 = arith.subf %3, %5 : vector<8x256xf32>
    %c0_5 = arith.constant 0 : index
    %c0_6 = arith.constant 0 : index
    %7 = vector.load %arg5[%c0_5, %c0_6] : memref<8x256xf32, #tpu.memory_space<vmem>>, vector<8x256xf32>
    tpu.vector_store %arg5[%c0_5, %c0_6], %6 {strides = array<i32>} : memref<8x256xf32, #tpu.memory_space<vmem>>, vector<8x256xf32>,
    return
  }
  func.func @transform_0(%arg0: i32, %arg1: i32) -> (i32, i32) {
    %c0_i32 = arith.constant 0 : i32
    %c0_i32_0 = arith.constant 0 : i32
    return %arg0, %c0_i32 : i32, i32
  }
  func.func @transform_1(%arg0: i32, %arg1: i32) -> (i32, i32) {
    %c0_i32 = arith.constant 0 : i32
    %c0_i32_0 = arith.constant 0 : i32
    return %arg0, %c0_i32 : i32, i32
  }
  func.func @transform_2(%arg0: i32, %arg1: i32) -> (i32, i32) {
    %c0_i32 = arith.constant 0 : i32
    return %arg0, %arg1 : i32, i32
  }
  func.func @transform_3(%arg0: i32, %arg1: i32) -> (i32, i32) {
    %c0_i32 = arith.constant 0 : i32
    return %arg0, %arg1 : i32, i32
  }
}

</mosaic_0001>

<bundles_post_ra>
// kernel: tpu_custom_call.1
= control target key start
LH: loop header
LB: loop body
LE: loop exit
PB: predicated region body
PF: predicated region fallthrough
CT: control target
= control target key end

     0   :  { %s117_s0 = inlined_call_operand.vmem [shape: f32[8,1], index: 0, kind: input, shape index: {}]   ;;  %s118_s1 = inlined_call_operand.vmem [shape: f32[8,1], index: 1, kind: input, shape index: {}]   ;;  %s119_s2 = inlined_call_operand.vmem [shape: f32[8,256], index: 2, kind: input, shape index: {}]   ;;  %s120_s3 = inlined_call_operand.hbm [shape: f32[8,256], index: 3, kind: output, shape index: {}]  }
   0x1   :  { %v17_v0 = vld [vmem:[%s117_s0] sm:$0xff] }
   0x2   :  { %8 = vsyncpa [#allocation3], 0  ;;  %v80_v1 = vmov 0   ;;  %v25_v2 = vld [vmem:[%s118_s1] sm:$0xff]  ;;  %v16_v5 = vld [vmem:[%s119_s2 + $0x8] sm:$0xff]  ;;  %s81_s0 = smov [#allocation2]  }
   0x3   :  { %53 = vset.pattern.permute.xlu0 %v80_v1  ;;  %v15_v4 = vld [vmem:[%s119_s2] sm:$0xff]  ;;  %s40_s20 = sshll.u32 %s81_s0, 4  ;;  %s42_s23 = sshll.u32 %s120_s3, 4  ;;  %s41_s20 = int_to_ptr.vmem [resolvable:$true] %s40_s20  ;;  %s43_s23 = int_to_ptr.hbm [resolvable:$true] %s42_s23 }
   0x4   :  { %20 = vperm.xlu0 %53, %v17_v0  }
   0xc   :  { %28 = vperm.xlu0 %53, %v25_v2  }
  0x76   :  { %v21_v3 = vpop.permute.xlu0 %20 }
  0x77   :  { %v23_v6 = vmul.f32 %v21_v3, %v15_v4  ;;  %v24_v7 = vmul.f32 %v21_v3, %v16_v5 }
  0x7e   :  { %v29_v8 = vpop.permute.xlu0 %28 }
  0x7f   :  { %v31_v9 = vsub.f32 %v23_v6, %v29_v8  ;;  %v32_v10 = vsub.f32 %v24_v7, %v29_v8 }
  0x81   :  { %33 = vst [vmem:[#allocation2] sm:$0xff] %v31_v9 }
  0x82   :  { %34 = vst [vmem:[#allocation2 + $0x8] sm:$0xff] %v32_v10 }
  0x83   :  { %45 = dma.vmem_to_hbm [thread:$0]  %s41_s20, 256, %s43_s23, [#allocation3]  }
  0x84   :  { %78 = dma.done.wait [#allocation3], 256  }
  0x85   :  { %79 = vsyncadd [#allocation3], 4294967040 }
  0x86   :  { %50 = vsyncpa [#allocation3], 1 }

</bundles_post_ra>
